<compile_context>
chip_gen: v6e
topology: v6e:2x2x1
jax: 0.10.0
libtpu: 0.0.40
codegen_flags: <defaults>
</compile_context>

<pallas_src>
import functools

import jax
import jax.numpy as jnp
from jax.experimental import pallas as pl
from jax.experimental.pallas import tpu as pltpu


def _anchor_loss_kernel(out_ref, tgt_ref, w_ref, loss_ref, acc_ref, *,
                        n_labels, batch, tile_rows, gamma, sigma):
    step = pl.program_id(0)

    @pl.when(step == 0)
    def _init():
        acc_ref[...] = jnp.zeros_like(acc_ref)

    logits = out_ref[...].astype(jnp.float32)       # (TB, 2N)
    target = tgt_ref[...].astype(jnp.float32)       # (TB, N)
    weights = w_ref[...]                            # (1, N) f32

    probs = jax.nn.sigmoid(logits)                  # (TB, 2N)
    pos = probs[:, :n_labels]                       # (TB, N)
    neg = probs[:, n_labels:]                       # (TB, N)

    inv_target = 1.0 - target
    thresh = target * pos + inv_target * neg - sigma

    log_pos = jnp.log(pos + 1e-12)
    log_one_m_pos = jnp.log(1.0 - pos + 1e-12)
    log_neg = jnp.log(neg + 1e-12)
    log_one_m_neg = jnp.log(1.0 - neg + 1e-12)

    base_pos = 1.0 + pos - thresh   # strictly in (sigma, 2 + sigma) > 0
    base_neg = 1.0 + neg - thresh
    if gamma == 0.5:                # module default: pow(x, 0.5) -> sqrt
        pow_pos = jnp.sqrt(base_pos)
        pow_neg = jnp.sqrt(base_neg)
    elif gamma == 1.0:
        pow_pos = base_pos
        pow_neg = base_neg
    else:
        pow_pos = jnp.power(base_pos, gamma)
        pow_neg = jnp.power(base_neg, gamma)

    total = (-(target * log_pos)
             - (inv_target * pow_pos * log_one_m_pos)
             - (inv_target * log_neg)
             - (target * pow_neg * log_one_m_neg))

    weighted = total * weights                      # (1,N) broadcast over (TB,N)

    if batch % tile_rows != 0:
        # Mask rows of the (padded) final block that lie past the real batch.
        row = step * tile_rows + jax.lax.broadcasted_iota(
            jnp.int32, weighted.shape, 0)
        weighted = jnp.where(row < batch, weighted, 0.0)

    acc_ref[...] += weighted

    @pl.when(step == pl.num_programs(0) - 1)
    def _finalize():
        loss_ref[0, 0] = jnp.sum(acc_ref[...]) * (1.0 / (batch * n_labels))


def _choose_tile_rows(batch, n_labels):
    # Bound double-buffered (logits + target) tiles + accumulator to ~4 MiB
    # so the kernel stays far below the (v7x-smallest) scoped VMEM limit.
    bytes_per_row = (2 * n_labels + n_labels) * 4 * 2 + n_labels * 4
    cap = (4 * 1024 * 1024) // max(bytes_per_row, 1)
    cap = max(8, min(1024, (cap // 8) * 8))
    if batch <= cap:
        return batch            # single block; sublane dim == full dim is legal
    return cap                  # multiple of 8; partial last block gets masked


def multitask_anchor_loss(output, target, log_vars, *, gamma=0.5, sigma=0.05):
    """output: (B, 2N) logits, target: (B, N) in {0,1}, log_vars: (N,). -> scalar f32."""
    B, two_n = output.shape
    N = target.shape[1]
    assert two_n == 2 * N

    # O(N) parameter math hoisted out of the kernel (computed once).
    log_vars = log_vars.astype(jnp.float32)
    inter_class_weights = jnp.exp(-2.0 * log_vars).reshape(1, N)
    sum_log_vars = jnp.sum(log_vars)

    tb = _choose_tile_rows(B, N)
    grid = (pl.cdiv(B, tb),)

    kernel = functools.partial(
        _anchor_loss_kernel, n_labels=N, batch=B, tile_rows=tb,
        gamma=float(gamma), sigma=float(sigma))

    mean_loss = pl.pallas_call(
        kernel,
        out_shape=jax.ShapeDtypeStruct((1, 1), jnp.float32),
        grid_spec=pltpu.PrefetchScalarGridSpec(
            num_scalar_prefetch=0,
            grid=grid,
            in_specs=[
                pl.BlockSpec((tb, 2 * N), lambda i: (i, 0)),   # logits tile
                pl.BlockSpec((tb, N), lambda i: (i, 0)),       # target tile
                pl.BlockSpec((1, N), lambda i: (0, 0)),        # per-label weights
            ],
            out_specs=pl.BlockSpec(memory_space=pltpu.SMEM),
            scratch_shapes=[pltpu.VMEM((tb, N), jnp.float32)],
        ),
        compiler_params=pltpu.CompilerParams(
            dimension_semantics=("arbitrary",),
            vmem_limit_bytes=32 * 1024 * 1024,
        ),
    )(output, target, inter_class_weights)

    # sum(log_vars) is added exactly once, outside the grid reduction.
    return mean_loss[0, 0] + sum_log_vars


def _reference_loss(output, target, log_vars, gamma, sigma):
    """Pure-JAX mirror of the PyTorch forward()."""
    inter_class_weights = jnp.exp(-2.0 * log_vars)
    sum_log_vars = jnp.sum(log_vars)
    n = target.shape[1]
    inv_target = 1.0 - target
    probs = jax.nn.sigmoid(output)
    pos_probs, neg_probs = probs[:, :n], probs[:, n:]
    thresh = target * pos_probs + inv_target * neg_probs - sigma
    pos_1 = -(target * jnp.log(pos_probs + 1e-12))
    pos_2 = -(inv_target * jnp.power(1.0 + pos_probs - thresh, gamma)
              * jnp.log(1.0 - pos_probs + 1e-12))
    neg_1 = -(inv_target * jnp.log(neg_probs + 1e-12))
    neg_2 = -(target * jnp.power(1.0 + neg_probs - thresh, gamma)
              * jnp.log(1.0 - neg_probs + 1e-12))
    total = pos_1 + pos_2 + neg_1 + neg_2
    weighted = total * inter_class_weights
    return jnp.mean(weighted) + sum_log_vars


if __name__ == "__main__":
    B = 8
    N_LABELS = 16
    GAMMA, SIGMA = 0.5, 0.05

    key = jax.random.PRNGKey(0)
    k_out, k_tgt, k_lv, k_icw = jax.random.split(key, 4)

    # Parameters (mirrors __init__): log_vars; intra_class_weights is stored
    # by the module but never used in forward(), so it only exists here.
    log_vars = (0.1 * jax.random.normal(k_lv, (N_LABELS,))).astype(jnp.float32)
    intra_class_weights = jax.random.uniform(k_icw, (N_LABELS,), dtype=jnp.float32)

    # Inputs: logits for 2*N_LABELS heads, binary multilabel targets.
    output = jax.random.normal(k_out, (B, 2 * N_LABELS), dtype=jnp.float32)
    target = (jax.random.uniform(k_tgt, (B, N_LABELS)) > 0.5).astype(jnp.float32)

    loss = multitask_anchor_loss(output, target, log_vars, gamma=GAMMA, sigma=SIGMA)
    loss = jax.block_until_ready(loss)

    ref = _reference_loss(output, target, log_vars, GAMMA, SIGMA)
    ref = jax.block_until_ready(ref)
    assert jnp.allclose(loss, ref, rtol=1e-5, atol=1e-5), (loss, ref)

    print("KERNEL_OK")
</pallas_src>

<mosaic_0001>
module attributes {stable_mosaic.version = 11 : i64} {
  func.func @_anchor_loss_kernel(%arg0: i32, %arg1: memref<8x32xf32, #tpu.memory_space<vmem>>, %arg2: memref<8x16xf32, #tpu.memory_space<vmem>>, %arg3: memref<1x16xf32, #tpu.memory_space<vmem>>, %arg4: memref<1x1xf32, #tpu.memory_space<smem>>, %arg5: memref<8x16xf32, #tpu.memory_space<vmem>>) attributes {dimension_semantics = [#tpu.dimension_semantics<arbitrary>], iteration_bounds = array<i64: 1>, scalar_prefetch = 0 : i64, scratch_operands = 1 : i64, tpu.core_type = #tpu.core_type<tc>, window_params = [{transform_indices = @transform_0, window_bounds = array<i64: 8, 32>}, {transform_indices = @transform_1, window_bounds = array<i64: 8, 16>}, {pipeline_mode = #tpu.pipeline_mode<synchronous>, transform_indices = @transform_2, window_bounds = array<i64: 1, 16>}, {transform_indices = @transform_3, window_bounds = array<i64: 1, 1>}]} {
    %c0_i32 = arith.constant 0 : i32
    %0 = arith.cmpi eq, %arg0, %c0_i32 : i32
    %1 = arith.extui %0 : i1 to i32
    %c0_i32_0 = arith.constant 0 : i32
    %2 = arith.cmpi ne, %1, %c0_i32_0 : i32
    scf.if %2 {
      %cst_23 = arith.constant 0.000000e+00 : f32
      %63 = vector.broadcast %cst_23 : f32 to vector<8x16xf32>
      %c0_24 = arith.constant 0 : index
      %c0_25 = arith.constant 0 : index
      %64 = vector.load %arg5[%c0_24, %c0_25] : memref<8x16xf32, #tpu.memory_space<vmem>>, vector<8x16xf32>
      tpu.vector_store %arg5[%c0_24, %c0_25], %63 {strides = array<i32>} : memref<8x16xf32, #tpu.memory_space<vmem>>, vector<8x16xf32>,
    } else {
    }
    %c0 = arith.constant 0 : index
    %c0_1 = arith.constant 0 : index
    %3 = vector.load %arg1[%c0, %c0_1] : memref<8x32xf32, #tpu.memory_space<vmem>>, vector<8x32xf32>
    %c0_2 = arith.constant 0 : index
    %c0_3 = arith.constant 0 : index
    %4 = vector.load %arg2[%c0_2, %c0_3] : memref<8x16xf32, #tpu.memory_space<vmem>>, vector<8x16xf32>
    %c0_4 = arith.constant 0 : index
    %c0_5 = arith.constant 0 : index
    %5 = vector.load %arg3[%c0_4, %c0_5] : memref<1x16xf32, #tpu.memory_space<vmem>>, vector<1x16xf32>
    %6 = arith.negf %3 : vector<8x32xf32>
    %7 = math.exp %6 : vector<8x32xf32>
    %cst = arith.constant 1.000000e+00 : f32
    %8 = vector.broadcast %cst : f32 to vector<8x32xf32>
    %9 = arith.addf %8, %7 : vector<8x32xf32>
    %10 = arith.divf %8, %9 : vector<8x32xf32>
    %11 = vector.extract_strided_slice %10 {offsets = [0, 0], sizes = [8, 16], strides = [1, 1]} : vector<8x32xf32> to vector<8x16xf32>
    %12 = vector.extract_strided_slice %10 {offsets = [0, 16], sizes = [8, 16], strides = [1, 1]} : vector<8x32xf32> to vector<8x16xf32>
    %cst_6 = arith.constant 1.000000e+00 : f32
    %13 = vector.broadcast %cst_6 : f32 to vector<8x16xf32>
    %14 = arith.subf %13, %4 : vector<8x16xf32>
    %15 = arith.mulf %4, %11 : vector<8x16xf32>
    %16 = arith.mulf %14, %12 : vector<8x16xf32>
    %17 = arith.addf %15, %16 : vector<8x16xf32>
    %cst_7 = arith.constant 5.000000e-02 : f32
    %18 = vector.broadcast %cst_7 : f32 to vector<8x16xf32>
    %19 = arith.subf %17, %18 : vector<8x16xf32>
    %cst_8 = arith.constant 9.99999996E-13 : f32
    %20 = vector.broadcast %cst_8 : f32 to vector<8x16xf32>
    %21 = arith.addf %11, %20 : vector<8x16xf32>
    %22 = math.log %21 : vector<8x16xf32>
    %cst_9 = arith.constant 1.000000e+00 : f32
    %23 = vector.broadcast %cst_9 : f32 to vector<8x16xf32>
    %24 = arith.subf %23, %11 : vector<8x16xf32>
    %cst_10 = arith.constant 9.99999996E-13 : f32
    %25 = vector.broadcast %cst_10 : f32 to vector<8x16xf32>
    %26 = arith.addf %24, %25 : vector<8x16xf32>
    %27 = math.log %26 : vector<8x16xf32>
    %cst_11 = arith.constant 9.99999996E-13 : f32
    %28 = vector.broadcast %cst_11 : f32 to vector<8x16xf32>
    %29 = arith.addf %12, %28 : vector<8x16xf32>
    %30 = math.log %29 : vector<8x16xf32>
    %cst_12 = arith.constant 1.000000e+00 : f32
    %31 = vector.broadcast %cst_12 : f32 to vector<8x16xf32>
    %32 = arith.subf %31, %12 : vector<8x16xf32>
    %cst_13 = arith.constant 9.99999996E-13 : f32
    %33 = vector.broadcast %cst_13 : f32 to vector<8x16xf32>
    %34 = arith.addf %32, %33 : vector<8x16xf32>
    %35 = math.log %34 : vector<8x16xf32>
    %cst_14 = arith.constant 1.000000e+00 : f32
    %36 = vector.broadcast %cst_14 : f32 to vector<8x16xf32>
    %37 = arith.addf %36, %11 : vector<8x16xf32>
    %38 = arith.subf %37, %19 : vector<8x16xf32>
    %cst_15 = arith.constant 1.000000e+00 : f32
    %39 = vector.broadcast %cst_15 : f32 to vector<8x16xf32>
    %40 = arith.addf %39, %12 : vector<8x16xf32>
    %41 = arith.subf %40, %19 : vector<8x16xf32>
    %42 = math.sqrt %38 : vector<8x16xf32>
    %43 = math.sqrt %41 : vector<8x16xf32>
    %44 = arith.mulf %4, %22 : vector<8x16xf32>
    %cst_16 = arith.constant 0.000000e+00 : f32
    %45 = vector.broadcast %cst_16 : f32 to vector<8x16xf32>
    %46 = arith.subf %45, %44 : vector<8x16xf32>
    %47 = arith.mulf %14, %42 : vector<8x16xf32>
    %48 = arith.mulf %47, %27 : vector<8x16xf32>
    %49 = arith.subf %46, %48 : vector<8x16xf32>
    %50 = arith.mulf %14, %30 : vector<8x16xf32>
    %51 = arith.subf %49, %50 : vector<8x16xf32>
    %52 = arith.mulf %4, %43 : vector<8x16xf32>
    %53 = arith.mulf %52, %35 : vector<8x16xf32>
    %54 = arith.subf %51, %53 : vector<8x16xf32>
    %55 = vector.broadcast %5 : vector<1x16xf32> to vector<8x16xf32>
    %56 = arith.mulf %54, %55 : vector<8x16xf32>
    %c0_17 = arith.constant 0 : index
    %c0_18 = arith.constant 0 : index
    %57 = vector.load %arg5[%c0_17, %c0_18] : memref<8x16xf32, #tpu.memory_space<vmem>>, vector<8x16xf32>
    %58 = arith.addf %57, %56 : vector<8x16xf32>
    %c0_19 = arith.constant 0 : index
    %c0_20 = arith.constant 0 : index
    %59 = vector.load %arg5[%c0_19, %c0_20] : memref<8x16xf32, #tpu.memory_space<vmem>>, vector<8x16xf32>
    tpu.vector_store %arg5[%c0_19, %c0_20], %58 {strides = array<i32>} : memref<8x16xf32, #tpu.memory_space<vmem>>, vector<8x16xf32>,
    %c0_i32_21 = arith.constant 0 : i32
    %60 = arith.cmpi eq, %arg0, %c0_i32_21 : i32
    %61 = arith.extui %60 : i1 to i32
    %c0_i32_22 = arith.constant 0 : i32
    %62 = arith.cmpi ne, %61, %c0_i32_22 : i32
    scf.if %62 {
      %c0_23 = arith.constant 0 : index
      %c0_24 = arith.constant 0 : index
      %63 = vector.load %arg5[%c0_23, %c0_24] : memref<8x16xf32, #tpu.memory_space<vmem>>, vector<8x16xf32>
      %64 = vector.shape_cast %63 : vector<8x16xf32> to vector<1x8x16xf32>
      %cst_25 = arith.constant dense<0.000000e+00> : vector<1xf32>
      %65 = vector.multi_reduction <add>, %64, %cst_25 [1, 2] : vector<1x8x16xf32> to vector<1xf32>
      %66 = vector.shape_cast %65 : vector<1xf32> to vector<1x1x1xf32>
      %67 = vector.extract %66[0, 0, 0] : f32 from vector<1x1x1xf32>
      %cst_26 = arith.constant 7.812500e-03 : f32
      %68 = arith.mulf %67, %cst_26 : f32
      %c0_27 = arith.constant 0 : index
      %c0_28 = arith.constant 0 : index
      %69 = memref.load %arg4[%c0_27, %c0_28] : memref<1x1xf32, #tpu.memory_space<smem>>
      memref.store %68, %arg4[%c0_27, %c0_28] : memref<1x1xf32, #tpu.memory_space<smem>>
    } else {
    }
    return
  }
  func.func @transform_0(%arg0: i32) -> (i32, i32) {
    %c0_i32 = arith.constant 0 : i32
    %c0_i32_0 = arith.constant 0 : i32
    return %arg0, %c0_i32 : i32, i32
  }
  func.func @transform_1(%arg0: i32) -> (i32, i32) {
    %c0_i32 = arith.constant 0 : i32
    %c0_i32_0 = arith.constant 0 : i32
    return %arg0, %c0_i32 : i32, i32
  }
  func.func @transform_2(%arg0: i32) -> (i32, i32) {
    %c0_i32 = arith.constant 0 : i32
    %c0_i32_0 = arith.constant 0 : i32
    %c0_i32_1 = arith.constant 0 : i32
    return %c0_i32, %c0_i32_0 : i32, i32
  }
  func.func @transform_3(%arg0: i32) -> (i32, i32) {
    %c0_i32 = arith.constant 0 : i32
    %c0_i32_0 = arith.constant 0 : i32
    %c0_i32_1 = arith.constant 0 : i32
    return %c0_i32, %c0_i32_0 : i32, i32
  }
}

</mosaic_0001>

<bundles_post_ra>
// kernel: tpu_custom_call.1
= control target key start
LH: loop header
LB: loop body
LE: loop exit
PB: predicated region body
PF: predicated region fallthrough
CT: control target
= control target key end

     0   :  { %8 = vsyncpa [#allocation4], 0  ;;  %s278_s0 = inlined_call_operand.hbm [shape: f32[8,32], index: 0, kind: input, shape index: {}]   ;;  %s279_s1 = inlined_call_operand.hbm [shape: f32[8,16], index: 1, kind: input, shape index: {}]   ;;  %s280_s2 = inlined_call_operand.vmem [shape: f32[1,16], index: 2, kind: input, shape index: {}]   ;;  %s281_s3 = inlined_call_operand.hbm [shape: f32[1,1], index: 3, kind: output, shape index: {}]  }
   0x1   :  { %9 = vsyncpa [#allocation7], 0 }
   0x2   :  { %10 = vsyncpa [#allocation5], 0  ;;  %s233_s12 = smov [#allocation3]   ;;  %s234_s14 = smov [#allocation6]  }
   0x3   :  { %s17_s13 = sshll.u32 %s233_s12, 4  ;;  %s27_s15 = sshll.u32 %s234_s14, 4  ;;  %s18_s13 = int_to_ptr.vmem [resolvable:$true] %s17_s13  ;;  %s28_s15 = int_to_ptr.vmem [resolvable:$true] %s27_s15 }
   0x4   :  { %s187_s16 = scalar_lea.vmem %s18_s13, 128  ;;  %p192_p1 = scmp.lt.s32.totalorder %s18_s13, %s18_s13 }
   0x5   :  { %p188_p0 = scmp.ne.s32.totalorder %s18_s13, %s187_s16  ;;  %p193_p2 = scmp.lt.s32.totalorder %s187_s16, %s187_s16 }
   0x7   :  { %p194_p3 = por %p193_p2, %p192_p1 }
   0x9   :  { %p195_p4 = pnand %p194_p3, %p188_p0 }
   0xb   :  { %198 = shalt.err (!%p195_p4)
}
   0xc   :  { %20 = dma.hbm_to_vmem [thread:$0]  %s278_s0, 128, %s18_s13, [#allocation4]  }
   0xd   :  { %s207_s19 = scalar_lea.vmem %s28_s15, 128  ;;  %p212_p6 = scmp.lt.s32.totalorder %s28_s15, %s28_s15 }
   0xe   :  { %p208_p5 = scmp.ne.s32.totalorder %s28_s15, %s207_s19  ;;  %p213_p7 = scmp.lt.s32.totalorder %s207_s19, %s207_s19 }
  0x10   :  { %p214_p8 = por %p213_p7, %p212_p6 }
  0x12   :  { %p215_p9 = pnand %p214_p8, %p208_p5 }
  0x14   :  { %218 = shalt.err (!%p215_p9)
}
  0x15   :  { %30 = dma.hbm_to_vmem [thread:$0]  %s279_s1, 128, %s28_s15, [#allocation7]  }
  0x16   :  { %227 = dma.done.wait [#allocation4], 128  }
  0x17   :  { %228 = vsyncadd [#allocation4], 4294967168 }
  0x18   :  { %229 = dma.done.wait [#allocation7], 128  }
  0x19   :  { %230 = vsyncadd [#allocation7], 4294967168  ;;  %v45_v0 = vld [vmem:[#allocation3] sm:$0xff]  ;;  %s235_s0 = smov 112   ;;  %v46_v10 = vld [vmem:[#allocation6] sm:$0xff]  ;;  %s236_s1 = smov 16  }
  0x1a   :  { %v156_v1 = vmul.f32 -1.442695, %v45_v0  ;;  %v54_v11 = vsub.f32 1.0, %v46_v10  ;;  %vm43_vm2 = vcmask 130048   ;;  %v237_v36 = vmov 0.0   ;;  %s238_s25 = smov [#allocation8]  }
  0x1b   :  { %44 = vst.msk [vmem:[#allocation2] sm:$0xff] %vm43_vm2, %v237_v36  ;;  %v158_v46 = vld [vmem:[%s280_s2] ss:$0 sm:$0xff] }
  0x1c   :  { %167 = vpow2.f32 %v156_v1 }
  0x22   :  { %v120_v48 = vld [vmem:[#allocation2] sm:$0xff] }
  0x29   :  { %v168_v2 = vpop.eup %167 }
  0x2a   :  { %v51_v3 = vadd.f32 1.0, %v168_v2 }
  0x2c   :  { %169 = vrcp.f32 %v51_v3 }
  0x39   :  { %v170_v4 = vpop.eup %169 }
  0x3a   :  { %57 = vrot.lane.b32.xlu0 %v170_v4, %s235_s0  ;;  %v63_v5 = vadd.f32 1e-12, %v170_v4  ;;  %v66_v8 = vsub.f32 1.0, %v170_v4  ;;  %v55_v12 = vmul.f32 %v170_v4, %v46_v10  ;;  %v70_v16 = vadd.f32 1.0, %v170_v4 }
  0x3c   :  { %171 = vlog2.f32 %v63_v5  ;;  %v67_v9 = vadd.f32 1e-12, %v66_v8 }
  0x3e   :  { %173 = vlog2.f32 %v67_v9 }
  0x49   :  { %v172_v6 = vpop.eup %171 }
  0x4a   :  { %v65_v7 = vmul.f32 0.6931472, %v172_v6 }
  0x4b   :  { %v174_v18 = vpop.eup %173 }
  0x4c   :  { %97 = vrot.lane.b32.xlu1 %v65_v7, %s235_s0  ;;  %v69_v20 = vmul.f32 0.6931472, %v174_v18  ;;  %v91_v22 = vmul.f32 %v65_v7, %v46_v10 }
  0x4e   :  { %v92_v28 = vsub.f32 0.0, %v91_v22 }
  0xac   :  { %v58_v13 = vpop.permute.xlu0 %57 }
  0xad   :  { %v60_v14 = vmul.f32 %v58_v13, %v54_v11 }
  0xaf   :  { %v61_v15 = vadd.f32 %v60_v14, %v55_v12 }
  0xb1   :  { %v157_v17 = vadd.f32 -0.05, %v61_v15 }
  0xb3   :  { %73 = vrot.lane.b32.xlu0 %v157_v17, %s236_s1  ;;  %v71_v19 = vsub.f32 %v70_v16, %v157_v17 }
  0xb5   :  { %175 = vrsqrt.f32 %v71_v19  ;;  %vm79_vm0 = vcmp.eq.f32.partialorder %v71_v19, inf  ;;  %v82_v24 = vand.u32 2147483648, %v71_v19  ;;  %vm81_vm1 = vcmp.eq.f32.partialorder %v71_v19, 0.0 }
  0xb7   :  { %108 = vrot.lane.b32.xlu0 %v69_v20, %s235_s0 }
  0xbe   :  { %v98_v26 = vpop.permute.xlu1 %97 }
  0xbf   :  { %v100_v31 = vmul.f32 %v98_v26, %v54_v11 }
  0xc2   :  { %v176_v21 = vpop.eup %175 }
  0xc3   :  { %v78_v23 = vmul.f32 %v176_v21, %v71_v19 }
  0xc5   :  { %v80_v25 = vsel %vm79_vm0, %v71_v19, %v78_v23 }
  0xc6   :  { %v83_v27 = vsel %vm81_vm1, %v82_v24, %v80_v25 }
  0xc7   :  { %v93_v29 = vmul.f32 %v83_v27, %v54_v11 }
  0xc9   :  { %v94_v30 = vmul.f32 %v93_v29, %v69_v20 }
  0xcb   :  { %v95_v32 = vsub.f32 %v92_v28, %v94_v30 }
  0xcd   :  { %v101_v33 = vsub.f32 %v95_v32, %v100_v31 }
 0x125   :  { %v74_v34 = vpop.permute.xlu0 %73 }
 0x126   :  { %v76_v35 = vsub.f32 %v70_v16, %v74_v34 }
 0x128   :  { %177 = vrsqrt.f32 %v76_v35  ;;  %vm86_vm3 = vcmp.eq.f32.partialorder %v76_v35, inf  ;;  %v89_v39 = vand.u32 2147483648, %v76_v35  ;;  %vm88_vm4 = vcmp.eq.f32.partialorder %v76_v35, 0.0 }
 0x129   :  { %v109_v43 = vpop.permute.xlu0 %108 }
 0x135   :  { %v178_v37 = vpop.eup %177 }
 0x136   :  { %v85_v38 = vmul.f32 %v178_v37, %v76_v35 }
 0x138   :  { %v87_v40 = vsel %vm86_vm3, %v76_v35, %v85_v38 }
 0x139   :  { %v90_v41 = vsel %vm88_vm4, %v89_v39, %v87_v40 }
 0x13a   :  { %103 = vrot.lane.b32.xlu1 %v90_v41, %s235_s0 }
 0x1ac   :  { %v104_v42 = vpop.permute.xlu1 %103 }
 0x1ad   :  { %v106_v44 = vmul.f32 %v104_v42, %v46_v10 }
 0x1af   :  { %v111_v45 = vmul.f32 %v109_v43, %v106_v44 }
 0x1b1   :  { %v112_v47 = vsub.f32 %v101_v33, %v111_v45 }
 0x1b3   :  { %v119_v49 = vmul.f32 %v158_v46, %v112_v47 }
 0x1b5   :  { %v121_v50 = vadd.f32 %v120_v48, %v119_v49 }
 0x1b7   :  { %123 = vst.msk [vmem:[#allocation2] sm:$0xff] %vm43_vm2, %v121_v50 }
 0x1be   :  { %v127_v51 = vld [vmem:[#allocation2] sm:$0xff] }
 0x1bf   :  { %v128_v52 = vsel %vm43_vm2, %v127_v51, 0.0 }
 0x1c0   :  { %129 = vadd.xlane.f32.xlu1 %v128_v52 }
 0x249   :  { %v130_v53 = vpop.xlane.xlu1 %129 }
 0x24a   :  { %v131_v54 = vrot.slane %v130_v53, 4 }
 0x24c   :  { %v132_v55 = vadd.f32 %v131_v54, %v130_v53 }
 0x24e   :  { %v133_v56 = vrot.slane %v132_v55, 2 }
 0x250   :  { %v134_v57 = vadd.f32 %v133_v56, %v132_v55 }
 0x252   :  { %v135_v58 = vrot.slane %v134_v57, 1 }
 0x254   :  { %v136_v59 = vadd.f32 %v135_v58, %v134_v57 }
 0x256   :  { %159 = vpush %v136_v59 }
 0x287   :  { %s160_s24 = spop %159 }
 0x288   :  { %s138_s2 = smul.f32 0.0078125, %s160_s24 }
 0x28a   :  { %140 = sst [smem:[#allocation8]] %s138_s2 }
 0x28b   :  { %148 = dma.smem_to_hbm %s238_s25, 16, %s281_s3, [#allocation5]  }
 0x28c   :  { %231 = dma.done.wait [#allocation5], 16  }
 0x28d   :  { %232 = vsyncadd [#allocation5], 4294967280 }
 0x28e   :  { %152 = sfence }
 0x28f   :  { %153 = vsyncpa [#allocation4], 1 }
 0x290   :  { %154 = vsyncpa [#allocation7], 1 }
 0x291   :  { %155 = vsyncpa [#allocation5], 1 }

</bundles_post_ra>
